<compile_context>
chip_gen: v6e
topology: v6e:2x2x1
jax: 0.10.0
libtpu: 0.0.40
codegen_flags: <defaults>
</compile_context>

<pallas_src>
import jax
import jax.numpy as jnp
from jax.experimental import pallas as pl
from jax.experimental.pallas import tpu as pltpu


_LANES = 1024           # lane-dense last dim (multiple of 128)
_MAX_BLOCK_ROWS = 512   # 512 * 1024 * 4 B = 2 MiB per f32 block


def _myfloor_kernel(up_ref, x_ref, o_ref):
    # up_ref: (1,) scalar in SMEM (scalar prefetch); x_ref/o_ref: VMEM tiles.
    up = up_ref[0]
    x = x_ref[...].astype(jnp.float32)
    y = jnp.clip(x / up, 0.0, 1.0) * up
    o_ref[...] = y.astype(o_ref.dtype)


def myfloor_forward(x: jax.Array, up) -> jax.Array:
    """y = clamp(x / up, 0, 1) * up, elementwise, same shape/dtype as x."""
    orig_shape = x.shape
    orig_dtype = x.dtype
    n = x.size

    xf = x.reshape(-1)

    # Lane-dense slab: rows x _LANES, rows padded to a multiple of block_rows.
    rows = pl.cdiv(n, _LANES)
    block_rows = min(_MAX_BLOCK_ROWS, ((rows + 7) // 8) * 8)
    rows_padded = pl.cdiv(rows, block_rows) * block_rows
    n_pad = rows_padded * _LANES - n
    if n_pad:
        # Slow path only when the size does not tile evenly.
        xf = jnp.pad(xf, (0, n_pad))
    x2 = xf.reshape(rows_padded, _LANES)

    grid = (rows_padded // block_rows,)
    block = (block_rows, _LANES)

    up_arr = jnp.asarray(up, dtype=jnp.float32).reshape(1)

    out2 = pl.pallas_call(
        _myfloor_kernel,
        out_shape=jax.ShapeDtypeStruct((rows_padded, _LANES), orig_dtype),
        grid_spec=pltpu.PrefetchScalarGridSpec(
            num_scalar_prefetch=1,
            grid=grid,
            in_specs=[pl.BlockSpec(block, lambda i, up_ref: (i, 0))],
            out_specs=pl.BlockSpec(block, lambda i, up_ref: (i, 0)),
        ),
        compiler_params=pltpu.CompilerParams(
            dimension_semantics=("parallel",)),
    )(up_arr, x2)

    out_flat = out2.reshape(-1)
    if n_pad:
        out_flat = out_flat[:n]
    return out_flat.reshape(orig_shape)


class MyFloor:
    """Mirrors the PyTorch module: learnable scalar `up`, unused `t`."""

    def __init__(self, up: float = 8.0, t: int = 32):
        self.up = jnp.array([up], dtype=jnp.float32)  # nn.Parameter analogue
        self.t = t

    def __call__(self, x):
        return myfloor_forward(x, self.up)


if __name__ == "__main__":
    key = jax.random.PRNGKey(0)
    # NCHW feature map; values spread beyond [0, up] so clamping is exercised.
    x = jax.random.uniform(key, (2, 4, 16, 16), dtype=jnp.float32,
                           minval=-4.0, maxval=12.0)

    module = MyFloor(up=8.0, t=32)
    out = module(x)
    out = jax.block_until_ready(out)

    # Pure-JAX reference.
    up_val = module.up[0]
    ref = jnp.clip(x / up_val, 0.0, 1.0) * up_val

    assert out.shape == x.shape and out.dtype == x.dtype
    assert bool(jnp.allclose(out, ref, rtol=0.0, atol=1e-6))

    print("KERNEL_OK")
</pallas_src>

<mosaic_0001>
module attributes {stable_mosaic.version = 11 : i64} {
  func.func @_myfloor_kernel(%arg0: i32, %arg1: memref<1xf32, #tpu.memory_space<smem>>, %arg2: memref<8x1024xf32, #tpu.memory_space<vmem>>, %arg3: memref<8x1024xf32, #tpu.memory_space<vmem>>) attributes {dimension_semantics = [#tpu.dimension_semantics<parallel>], iteration_bounds = array<i64: 1>, scalar_prefetch = 1 : i64, scratch_operands = 0 : i64, tpu.core_type = #tpu.core_type<tc>, window_params = [{transform_indices = @transform_0, window_bounds = array<i64: 8, 1024>}, {transform_indices = @transform_1, window_bounds = array<i64: 8, 1024>}]} {
    %c0 = arith.constant 0 : index
    %0 = memref.load %arg1[%c0] : memref<1xf32, #tpu.memory_space<smem>>
    %c0_0 = arith.constant 0 : index
    %c0_1 = arith.constant 0 : index
    %1 = vector.load %arg2[%c0_0, %c0_1] : memref<8x1024xf32, #tpu.memory_space<vmem>>, vector<8x1024xf32>
    %2 = vector.broadcast %0 : f32 to vector<8x1024xf32>
    %3 = arith.divf %1, %2 : vector<8x1024xf32>
    %cst = arith.constant 0.000000e+00 : f32
    %cst_2 = arith.constant 1.000000e+00 : f32
    %4 = vector.broadcast %cst : f32 to vector<8x1024xf32>
    %5 = arith.maximumf %4, %3 : vector<8x1024xf32>
    %6 = vector.broadcast %cst_2 : f32 to vector<8x1024xf32>
    %7 = arith.minimumf %6, %5 : vector<8x1024xf32>
    %8 = vector.broadcast %0 : f32 to vector<8x1024xf32>
    %9 = arith.mulf %7, %8 : vector<8x1024xf32>
    %c0_3 = arith.constant 0 : index
    %c0_4 = arith.constant 0 : index
    %10 = vector.load %arg3[%c0_3, %c0_4] : memref<8x1024xf32, #tpu.memory_space<vmem>>, vector<8x1024xf32>
    tpu.vector_store %arg3[%c0_3, %c0_4], %9 {strides = array<i32>} : memref<8x1024xf32, #tpu.memory_space<vmem>>, vector<8x1024xf32>,
    return
  }
  func.func @transform_0(%arg0: i32, %arg1: memref<1xf32, #tpu.memory_space<smem>>) -> (i32, i32) {
    %c0_i32 = arith.constant 0 : i32
    %c0_i32_0 = arith.constant 0 : i32
    return %arg0, %c0_i32 : i32, i32
  }
  func.func @transform_1(%arg0: i32, %arg1: memref<1xf32, #tpu.memory_space<smem>>) -> (i32, i32) {
    %c0_i32 = arith.constant 0 : i32
    %c0_i32_0 = arith.constant 0 : i32
    return %arg0, %c0_i32 : i32, i32
  }
}

</mosaic_0001>

<bundles_post_ra>
// kernel: tpu_custom_call.1
= control target key start
LH: loop header
LB: loop body
LE: loop exit
PB: predicated region body
PF: predicated region fallthrough
CT: control target
= control target key end

     0   :  { %8 = vsyncpa [#allocation5], 0  ;;  %s163_s0 = inlined_call_operand.<no memory space> [shape: f32[1], index: 0, kind: input, shape index: {}]   ;;  %s164_s1 = inlined_call_operand.hbm [shape: f32[8,1024], index: 1, kind: input, shape index: {}]   ;;  %s165_s2 = inlined_call_operand.hbm [shape: f32[8,1024], index: 2, kind: output, shape index: {}]  }
   0x1   :  { %9 = vsyncpa [#allocation6], 0  ;;  %s137_s9 = smov [#allocation4]  }
   0x2   :  { %s16_s10 = sshll.u32 %s137_s9, 4  ;;  %s17_s10 = int_to_ptr.vmem [resolvable:$true] %s16_s10 }
   0x3   :  { %s101_s11 = scalar_lea.vmem %s17_s10, 1024  ;;  %p106_p1 = scmp.lt.s32.totalorder %s17_s10, %s17_s10 }
   0x4   :  { %p102_p0 = scmp.ne.s32.totalorder %s17_s10, %s101_s11  ;;  %p107_p2 = scmp.lt.s32.totalorder %s101_s11, %s101_s11 }
   0x6   :  { %p108_p3 = por %p107_p2, %p106_p1 }
   0x8   :  { %p109_p4 = pnand %p108_p3, %p102_p0 }
   0xa   :  { %112 = shalt.err (!%p109_p4)
}
   0xb   :  { %19 = dma.hbm_to_vmem [thread:$0]  %s164_s1, 1024, %s17_s10, [#allocation5]  }
   0xc   :  { %133 = dma.done.wait [#allocation5], 1024  }
   0xd   :  { %134 = vsyncadd [#allocation5], 4294966272  ;;  %v32_v0 = vstv %s163_s0  ;;  %v24_v1 = vld [vmem:[#allocation4] sm:$0xff]  ;;  %v25_v2 = vld [vmem:[#allocation4 + $0x8] sm:$0xff]  ;;  %s138_s0 = smov [#allocation7]  }
   0xe   :  { %91 = vrcp.f32 %v32_v0  ;;  %v26_v3 = vld [vmem:[#allocation4 + $0x10] sm:$0xff]  ;;  %v27_v4 = vld [vmem:[#allocation4 + $0x18] sm:$0xff]  ;;  %v28_v5 = vld [vmem:[#allocation4 + $0x20] sm:$0xff]  ;;  %s80_s1 = sshll.u32 %s138_s0, 4  ;;  %s81_s1 = int_to_ptr.vmem [resolvable:$true] %s80_s1 }
   0xf   :  { %v29_v6 = vld [vmem:[#allocation4 + $0x28] sm:$0xff]  ;;  %v30_v7 = vld [vmem:[#allocation4 + $0x30] sm:$0xff]  ;;  %v31_v8 = vld [vmem:[#allocation4 + $0x38] sm:$0xff]  ;;  %s113_s16 = scalar_lea.vmem %s81_s1, 1024  ;;  %p118_p6 = scmp.lt.s32.totalorder %s81_s1, %s81_s1 }
  0x10   :  { %p114_p5 = scmp.ne.s32.totalorder %s81_s1, %s113_s16  ;;  %p119_p7 = scmp.lt.s32.totalorder %s113_s16, %s113_s16 }
  0x12   :  { %p120_p8 = por %p119_p7, %p118_p6 }
  0x14   :  { %p121_p9 = pnand %p120_p8, %p114_p5 }
  0x1b   :  { %v92_v9 = vpop.eup %91 }
  0x1c   :  { %v34_v10 = vmul.f32 %v92_v9, %v24_v1  ;;  %v35_v11 = vmul.f32 %v92_v9, %v25_v2  ;;  %v36_v12 = vmul.f32 %v92_v9, %v26_v3  ;;  %v37_v13 = vmul.f32 %v92_v9, %v27_v4 }
  0x1d   :  { %v38_v14 = vmul.f32 %v92_v9, %v28_v5  ;;  %v39_v15 = vmul.f32 %v92_v9, %v29_v6  ;;  %v40_v16 = vmul.f32 %v92_v9, %v30_v7  ;;  %v41_v17 = vmul.f32 %v92_v9, %v31_v8 }
  0x1e   :  { %v42_v18 = vmax.f32 %v34_v10, 0.0  ;;  %v43_v19 = vmax.f32 %v35_v11, 0.0  ;;  %v44_v20 = vmax.f32 %v36_v12, 0.0  ;;  %v45_v21 = vmax.f32 %v37_v13, 0.0 }
  0x1f   :  { %v46_v22 = vmax.f32 %v38_v14, 0.0  ;;  %v47_v23 = vmax.f32 %v39_v15, 0.0  ;;  %v48_v24 = vmax.f32 %v40_v16, 0.0  ;;  %v49_v25 = vmax.f32 %v41_v17, 0.0 }
  0x20   :  { %v50_v26 = vmin.f32 %v42_v18, 1.0  ;;  %v51_v27 = vmin.f32 %v43_v19, 1.0  ;;  %v52_v28 = vmin.f32 %v44_v20, 1.0  ;;  %v53_v29 = vmin.f32 %v45_v21, 1.0 }
  0x21   :  { %v54_v30 = vmin.f32 %v46_v22, 1.0  ;;  %v55_v31 = vmin.f32 %v47_v23, 1.0  ;;  %v56_v32 = vmin.f32 %v48_v24, 1.0  ;;  %v57_v33 = vmin.f32 %v49_v25, 1.0 }
  0x22   :  { %v58_v34 = vmul.f32 %v50_v26, %v32_v0  ;;  %v59_v35 = vmul.f32 %v51_v27, %v32_v0  ;;  %v60_v36 = vmul.f32 %v52_v28, %v32_v0  ;;  %v61_v37 = vmul.f32 %v53_v29, %v32_v0 }
  0x23   :  { %v62_v38 = vmul.f32 %v54_v30, %v32_v0  ;;  %v63_v39 = vmul.f32 %v55_v31, %v32_v0  ;;  %v64_v40 = vmul.f32 %v56_v32, %v32_v0  ;;  %v65_v41 = vmul.f32 %v57_v33, %v32_v0 }
  0x24   :  { %66 = vst [vmem:[#allocation7] sm:$0xff] %v58_v34  ;;  %67 = vst [vmem:[#allocation7 + $0x8] sm:$0xff] %v59_v35 }
  0x25   :  { %68 = vst [vmem:[#allocation7 + $0x10] sm:$0xff] %v60_v36  ;;  %69 = vst [vmem:[#allocation7 + $0x18] sm:$0xff] %v61_v37 }
  0x26   :  { %70 = vst [vmem:[#allocation7 + $0x20] sm:$0xff] %v62_v38  ;;  %71 = vst [vmem:[#allocation7 + $0x28] sm:$0xff] %v63_v39 }
  0x27   :  { %72 = vst [vmem:[#allocation7 + $0x30] sm:$0xff] %v64_v40  ;;  %73 = vst [vmem:[#allocation7 + $0x38] sm:$0xff] %v65_v41 }
  0x28   :  { %124 = shalt.err (!%p121_p9)
}
  0x29   :  { %83 = dma.vmem_to_hbm [thread:$0]  %s81_s1, 1024, %s165_s2, [#allocation6]  }
  0x2a   :  { %135 = dma.done.wait [#allocation6], 1024  }
  0x2b   :  { %136 = vsyncadd [#allocation6], 4294966272 }
  0x2c   :  { %87 = vsyncpa [#allocation5], 1 }
  0x2d   :  { %88 = vsyncpa [#allocation6], 1 }

</bundles_post_ra>
